<compile_context>
chip_gen: v7x
topology: tpu7x:2x2x1
jax: 0.10.0
libtpu: 0.0.40
codegen_flags: <defaults>
</compile_context>

<pallas_src>
import functools

import jax
import jax.numpy as jnp
from jax.experimental import pallas as pl
from jax.experimental.pallas import tpu as pltpu


def _gelu_tanh(x):
    # tanh-approximate GELU (EUP-friendly).
    # TODO(synk): PyTorch's default GELU is erf-based; `transform` is caller-supplied in
    # the original module, so the tanh variant is used here for robust TPU lowering.
    c = 0.7978845608028654  # sqrt(2/pi)
    return 0.5 * x * (1.0 + jnp.tanh(c * (x + 0.044715 * x * x * x)))


def _round_up(a, b):
    return (a + b - 1) // b * b


def sparse_head_kernel(x_ref, wt_ref, bt_ref, g_ref, b_ref, wd_ref, bd_ref,
                       o_ref, h_ref, *, h_real):
    """Grid = (row tiles i, vocab tiles j); j is the inner (sequential) axis."""

    # ---- transform: Dense(H->H) + GELU + LayerNorm, once per row tile ----
    @pl.when(pl.program_id(1) == 0)
    def _():
        x = x_ref[...]                                                    # bf16 [tm, Hp]
        h = jnp.dot(x, wt_ref[...], preferred_element_type=jnp.float32)  # MXU, f32 acc
        h = h + bt_ref[...]                                               # [1, Hp] bcast
        h = _gelu_tanh(h)
        # One-pass LayerNorm stats.  Padded lanes of h are exactly 0, so summing over
        # the padded width and dividing by the true H gives the exact statistics.
        inv_h = 1.0 / h_real
        mu = jnp.sum(h, axis=-1, keepdims=True) * inv_h
        ms = jnp.sum(h * h, axis=-1, keepdims=True) * inv_h
        var = ms - mu * mu
        h = (h - mu) * jax.lax.rsqrt(var + 1e-12)
        h = h * g_ref[...] + b_ref[...]            # padded lanes -> 0 (gamma/beta padded 0)
        h_ref[...] = h.astype(h_ref.dtype)         # cache transform output (bf16) once

    # ---- decoder: Linear(H -> tv vocab slice) + bias ----
    out = jnp.dot(h_ref[...], wd_ref[...],
                  preferred_element_type=jnp.float32)                     # MXU, f32 acc
    out = out + bd_ref[...]
    o_ref[...] = out.astype(o_ref.dtype)


@functools.partial(jax.jit, static_argnames=("tm", "tv", "mxu_dtype"))
def sparse_head(x, wt, bt, gamma, beta, wd, bd, *, tm=256, tv=2048,
                mxu_dtype=jnp.bfloat16):
    """x: [B, S, H]; wd: [H, V] (decoder weight, already transposed vs. nn.Linear).

    Returns [B, S, V] with V = vocab_size * multi_channel_number.
    """
    B, S, H = x.shape
    V = wd.shape[1]
    M = B * S

    # Tile / padding plan (static under jit).
    tm = _round_up(tm, 8)
    tv = _round_up(tv, 128)
    H_pad = _round_up(H, 128)                       # lane-pad the hidden dim
    tm_eff = min(tm, _round_up(M, 8))               # don't over-tile tiny problems
    M_pad = _round_up(M, tm_eff)
    tv_eff = min(tv, _round_up(V, 128))
    V_pad = _round_up(V, tv_eff)

    # Flatten + zero-pad; cast MXU operands (x, wt, wd) to bf16 (halves wd HBM traffic).
    x2 = jnp.pad(x.reshape(M, H).astype(mxu_dtype),
                 ((0, M_pad - M), (0, H_pad - H)))
    wt_p = jnp.pad(wt.astype(mxu_dtype), ((0, H_pad - H), (0, H_pad - H)))
    wd_p = jnp.pad(wd.astype(mxu_dtype), ((0, H_pad - H), (0, V_pad - V)))
    bt_p = jnp.pad(bt.astype(jnp.float32), (0, H_pad - H)).reshape(1, H_pad)
    g_p = jnp.pad(gamma.astype(jnp.float32), (0, H_pad - H)).reshape(1, H_pad)
    b_p = jnp.pad(beta.astype(jnp.float32), (0, H_pad - H)).reshape(1, H_pad)
    bd_p = jnp.pad(bd.astype(jnp.float32), (0, V_pad - V)).reshape(1, V_pad)

    grid = (M_pad // tm_eff, V_pad // tv_eff)
    kernel = functools.partial(sparse_head_kernel, h_real=H)

    # Advisory cost hint for the XLA scheduler around the custom call.
    flops = 2 * M_pad * H_pad * H_pad + 2 * M_pad * H_pad * V_pad
    bytes_accessed = (x2.size * 2 + wt_p.size * 2 + grid[0] * wd_p.size * 2
                      + M_pad * V_pad * x.dtype.itemsize)
    cost = pl.CostEstimate(flops=flops, transcendentals=M_pad * H_pad,
                           bytes_accessed=bytes_accessed)

    out = pl.pallas_call(
        kernel,
        out_shape=jax.ShapeDtypeStruct((M_pad, V_pad), x.dtype),
        grid_spec=pltpu.PrefetchScalarGridSpec(
            num_scalar_prefetch=0,
            grid=grid,
            in_specs=[
                # Constant-index blocks are only DMA'd when their block index changes.
                pl.BlockSpec((tm_eff, H_pad), lambda i, j: (i, 0)),    # x row tile
                pl.BlockSpec((H_pad, H_pad), lambda i, j: (0, 0)),     # transform weight
                pl.BlockSpec((1, H_pad), lambda i, j: (0, 0)),         # transform bias
                pl.BlockSpec((1, H_pad), lambda i, j: (0, 0)),         # LN gamma
                pl.BlockSpec((1, H_pad), lambda i, j: (0, 0)),         # LN beta
                pl.BlockSpec((H_pad, tv_eff), lambda i, j: (0, j)),    # decoder weight tile
                pl.BlockSpec((1, tv_eff), lambda i, j: (0, j)),        # decoder bias tile
            ],
            out_specs=pl.BlockSpec((tm_eff, tv_eff), lambda i, j: (i, j)),
            scratch_shapes=[pltpu.VMEM((tm_eff, H_pad), mxu_dtype)],   # cached transform
        ),
        compiler_params=pltpu.CompilerParams(
            dimension_semantics=("parallel", "arbitrary"),
            vmem_limit_bytes=64 * 1024 * 1024,
        ),
        cost_estimate=cost,
    )(x2, wt_p, bt_p, g_p, b_p, wd_p, bd_p)

    return out[:M, :V].reshape(B, S, V)


def _reference(x, wt, bt, gamma, beta, wd, bd, mxu_dtype=jnp.bfloat16):
    # Mirrors the kernel's mixed precision (bf16 MXU operands, f32 accumulate / math,
    # bf16 re-cast of the transform output before the decoder matmul).
    h = jnp.einsum("bsh,hk->bsk", x.astype(mxu_dtype), wt.astype(mxu_dtype),
                   preferred_element_type=jnp.float32) + bt
    h = _gelu_tanh(h)
    mu = jnp.mean(h, axis=-1, keepdims=True)
    var = jnp.mean((h - mu) ** 2, axis=-1, keepdims=True)
    h = (h - mu) * jax.lax.rsqrt(var + 1e-12) * gamma + beta
    return jnp.einsum("bsh,hv->bsv", h.astype(mxu_dtype), wd.astype(mxu_dtype),
                      preferred_element_type=jnp.float32) + bd


def _make_inputs(key, B, S, H, V):
    kx, kwt, kbt, kwd, kbd = jax.random.split(key, 5)
    x = jax.random.normal(kx, (B, S, H), dtype=jnp.float32)
    # transform (BERT-style prediction-head transform) parameters
    wt = jax.random.normal(kwt, (H, H), jnp.float32) * 0.05
    bt = jax.random.normal(kbt, (H,), jnp.float32) * 0.01
    gamma = jnp.ones((H,), jnp.float32)
    beta = jnp.zeros((H,), jnp.float32)
    # decoder: nn.Linear(H, vocab*mc, bias=False); self.bias = zeros param
    wd = jax.random.normal(kwd, (H, V), jnp.float32) * 0.05
    bd = jax.random.normal(kbd, (V,), jnp.float32) * 0.01
    return x, wt, bt, gamma, beta, wd, bd


def _check(out, ref, tag):
    max_err = float(jnp.max(jnp.abs(out - ref)))
    assert jnp.allclose(out, ref, atol=2e-2, rtol=2e-2), (
        f"{tag}: mismatch vs JAX reference (max abs err {max_err})")


if __name__ == "__main__":
    key = jax.random.PRNGKey(0)
    k1, k2 = jax.random.split(key)

    # --- small config consistent with the module (single-tile fast path) ---
    B, S = 2, 8
    hidden_size = 32
    vocab_size = 64
    multi_channel_number = 2
    V = vocab_size * multi_channel_number  # 128

    args = _make_inputs(k1, B, S, hidden_size, V)
    out = jax.block_until_ready(sparse_head(*args))
    assert out.shape == (B, S, V)
    _check(out, _reference(*args), "single-tile")

    # --- multi-tile config: exercises the 2-D grid, padding and the scratch carry ---
    B2, S2 = 2, 16
    H2 = 48                       # pads to 128 lanes
    V2 = 100 * 3                  # pads to 384 -> 3 vocab tiles at tv=128
    args2 = _make_inputs(k2, B2, S2, H2, V2)
    out2 = jax.block_until_ready(sparse_head(*args2, tm=16, tv=128))
    assert out2.shape == (B2, S2, V2)
    _check(out2, _reference(*args2), "multi-tile")

    print("KERNEL_OK")
</pallas_src>

<mosaic_0001>
module attributes {stable_mosaic.version = 11 : i64} {
  func.func @sparse_head_kernel(%arg0: i32, %arg1: i32, %arg2: memref<16x128xbf16, #tpu.memory_space<vmem>>, %arg3: memref<128x128xbf16, #tpu.memory_space<vmem>>, %arg4: memref<1x128xf32, #tpu.memory_space<vmem>>, %arg5: memref<1x128xf32, #tpu.memory_space<vmem>>, %arg6: memref<1x128xf32, #tpu.memory_space<vmem>>, %arg7: memref<128x128xbf16, #tpu.memory_space<vmem>>, %arg8: memref<1x128xf32, #tpu.memory_space<vmem>>, %arg9: memref<16x128xf32, #tpu.memory_space<vmem>>, %arg10: memref<16x128xbf16, #tpu.memory_space<vmem>>) attributes {dimension_semantics = [#tpu.dimension_semantics<parallel>, #tpu.dimension_semantics<arbitrary>], iteration_bounds = array<i64: 1, 1>, scalar_prefetch = 0 : i64, scratch_operands = 1 : i64, tpu.core_type = #tpu.core_type<tc>, window_params = [{transform_indices = @transform_0, window_bounds = array<i64: 16, 128>}, {pipeline_mode = #tpu.pipeline_mode<synchronous>, transform_indices = @transform_1, window_bounds = array<i64: 128, 128>}, {pipeline_mode = #tpu.pipeline_mode<synchronous>, transform_indices = @transform_2, window_bounds = array<i64: 1, 128>}, {pipeline_mode = #tpu.pipeline_mode<synchronous>, transform_indices = @transform_3, window_bounds = array<i64: 1, 128>}, {pipeline_mode = #tpu.pipeline_mode<synchronous>, transform_indices = @transform_4, window_bounds = array<i64: 1, 128>}, {transform_indices = @transform_5, window_bounds = array<i64: 128, 128>}, {transform_indices = @transform_6, window_bounds = array<i64: 1, 128>}, {transform_indices = @transform_7, window_bounds = array<i64: 16, 128>}]} {
    %c0_i32 = arith.constant 0 : i32
    %0 = arith.cmpi eq, %arg1, %c0_i32 : i32
    %1 = arith.extui %0 : i1 to i32
    %c0_i32_0 = arith.constant 0 : i32
    %2 = arith.cmpi ne, %1, %c0_i32_0 : i32
    scf.if %2 {
      %c0_8 = arith.constant 0 : index
      %c0_9 = arith.constant 0 : index
      %10 = vector.load %arg2[%c0_8, %c0_9] : memref<16x128xbf16, #tpu.memory_space<vmem>>, vector<16x128xbf16>
      %c0_10 = arith.constant 0 : index
      %c0_11 = arith.constant 0 : index
      %11 = vector.load %arg3[%c0_10, %c0_11] : memref<128x128xbf16, #tpu.memory_space<vmem>>, vector<128x128xbf16>
      %cst_12 = arith.constant dense<0.000000e+00> : vector<16x128xf32>
      %12 = tpu.matmul %10, %11, %cst_12 {dimension_numbers = #tpu.dot_dimension_numbers<[1], [0], [0], [1], [0, 0, 1, 1], [], []>} : vector<16x128xbf16>, vector<128x128xbf16>, vector<16x128xf32> -> vector<16x128xf32>
      %c0_13 = arith.constant 0 : index
      %c0_14 = arith.constant 0 : index
      %13 = vector.load %arg4[%c0_13, %c0_14] : memref<1x128xf32, #tpu.memory_space<vmem>>, vector<1x128xf32>
      %14 = vector.broadcast %13 : vector<1x128xf32> to vector<16x128xf32>
      %15 = arith.addf %12, %14 : vector<16x128xf32>
      %cst_15 = arith.constant 5.000000e-01 : f32
      %16 = vector.broadcast %cst_15 : f32 to vector<16x128xf32>
      %17 = arith.mulf %16, %15 : vector<16x128xf32>
      %cst_16 = arith.constant 4.471500e-02 : f32
      %18 = vector.broadcast %cst_16 : f32 to vector<16x128xf32>
      %19 = arith.mulf %18, %15 : vector<16x128xf32>
      %20 = arith.mulf %19, %15 : vector<16x128xf32>
      %21 = arith.mulf %20, %15 : vector<16x128xf32>
      %22 = arith.addf %15, %21 : vector<16x128xf32>
      %cst_17 = arith.constant 0.797884583 : f32
      %23 = vector.broadcast %cst_17 : f32 to vector<16x128xf32>
      %24 = arith.mulf %23, %22 : vector<16x128xf32>
      %25 = math.tanh %24 : vector<16x128xf32>
      %cst_18 = arith.constant 1.000000e+00 : f32
      %26 = vector.broadcast %cst_18 : f32 to vector<16x128xf32>
      %27 = arith.addf %26, %25 : vector<16x128xf32>
      %28 = arith.mulf %17, %27 : vector<16x128xf32>
      %cst_19 = arith.constant dense<0.000000e+00> : vector<16xf32>
      %29 = vector.multi_reduction <add>, %28, %cst_19 [1] : vector<16x128xf32> to vector<16xf32>
      %30 = vector.shape_cast %29 : vector<16xf32> to vector<16x1xf32>
      %cst_20 = arith.constant 3.125000e-02 : f32
      %31 = vector.broadcast %cst_20 : f32 to vector<16x1xf32>
      %32 = arith.mulf %30, %31 : vector<16x1xf32>
      %33 = arith.mulf %28, %28 : vector<16x128xf32>
      %cst_21 = arith.constant dense<0.000000e+00> : vector<16xf32>
      %34 = vector.multi_reduction <add>, %33, %cst_21 [1] : vector<16x128xf32> to vector<16xf32>
      %35 = vector.shape_cast %34 : vector<16xf32> to vector<16x1xf32>
      %cst_22 = arith.constant 3.125000e-02 : f32
      %36 = vector.broadcast %cst_22 : f32 to vector<16x1xf32>
      %37 = arith.mulf %35, %36 : vector<16x1xf32>
      %38 = arith.mulf %32, %32 : vector<16x1xf32>
      %39 = arith.subf %37, %38 : vector<16x1xf32>
      %40 = vector.broadcast %32 : vector<16x1xf32> to vector<16x128xf32>
      %41 = arith.subf %28, %40 : vector<16x128xf32>
      %cst_23 = arith.constant 9.99999996E-13 : f32
      %42 = vector.broadcast %cst_23 : f32 to vector<16x1xf32>
      %43 = arith.addf %39, %42 : vector<16x1xf32>
      %44 = math.rsqrt %43 : vector<16x1xf32>
      %45 = vector.broadcast %44 : vector<16x1xf32> to vector<16x128xf32>
      %46 = arith.mulf %41, %45 : vector<16x128xf32>
      %c0_24 = arith.constant 0 : index
      %c0_25 = arith.constant 0 : index
      %47 = vector.load %arg5[%c0_24, %c0_25] : memref<1x128xf32, #tpu.memory_space<vmem>>, vector<1x128xf32>
      %48 = vector.broadcast %47 : vector<1x128xf32> to vector<16x128xf32>
      %49 = arith.mulf %46, %48 : vector<16x128xf32>
      %c0_26 = arith.constant 0 : index
      %c0_27 = arith.constant 0 : index
      %50 = vector.load %arg6[%c0_26, %c0_27] : memref<1x128xf32, #tpu.memory_space<vmem>>, vector<1x128xf32>
      %51 = vector.broadcast %50 : vector<1x128xf32> to vector<16x128xf32>
      %52 = arith.addf %49, %51 : vector<16x128xf32>
      %53 = arith.truncf %52 : vector<16x128xf32> to vector<16x128xbf16>
      %c0_28 = arith.constant 0 : index
      %c0_29 = arith.constant 0 : index
      %54 = vector.load %arg10[%c0_28, %c0_29] : memref<16x128xbf16, #tpu.memory_space<vmem>>, vector<16x128xbf16>
      tpu.vector_store %arg10[%c0_28, %c0_29], %53 {strides = array<i32>} : memref<16x128xbf16, #tpu.memory_space<vmem>>, vector<16x128xbf16>,
    } else {
    }
    %c0 = arith.constant 0 : index
    %c0_1 = arith.constant 0 : index
    %3 = vector.load %arg10[%c0, %c0_1] : memref<16x128xbf16, #tpu.memory_space<vmem>>, vector<16x128xbf16>
    %c0_2 = arith.constant 0 : index
    %c0_3 = arith.constant 0 : index
    %4 = vector.load %arg7[%c0_2, %c0_3] : memref<128x128xbf16, #tpu.memory_space<vmem>>, vector<128x128xbf16>
    %cst = arith.constant dense<0.000000e+00> : vector<16x128xf32>
    %5 = tpu.matmul %3, %4, %cst {dimension_numbers = #tpu.dot_dimension_numbers<[1], [0], [0], [1], [0, 0, 1, 1], [], []>} : vector<16x128xbf16>, vector<128x128xbf16>, vector<16x128xf32> -> vector<16x128xf32>
    %c0_4 = arith.constant 0 : index
    %c0_5 = arith.constant 0 : index
    %6 = vector.load %arg8[%c0_4, %c0_5] : memref<1x128xf32, #tpu.memory_space<vmem>>, vector<1x128xf32>
    %7 = vector.broadcast %6 : vector<1x128xf32> to vector<16x128xf32>
    %8 = arith.addf %5, %7 : vector<16x128xf32>
    %c0_6 = arith.constant 0 : index
    %c0_7 = arith.constant 0 : index
    %9 = vector.load %arg9[%c0_6, %c0_7] : memref<16x128xf32, #tpu.memory_space<vmem>>, vector<16x128xf32>
    tpu.vector_store %arg9[%c0_6, %c0_7], %8 {strides = array<i32>} : memref<16x128xf32, #tpu.memory_space<vmem>>, vector<16x128xf32>,
    return
  }
  func.func @transform_0(%arg0: i32, %arg1: i32) -> (i32, i32) {
    %c0_i32 = arith.constant 0 : i32
    %c0_i32_0 = arith.constant 0 : i32
    return %arg0, %c0_i32 : i32, i32
  }
  func.func @transform_1(%arg0: i32, %arg1: i32) -> (i32, i32) {
    %c0_i32 = arith.constant 0 : i32
    %c0_i32_0 = arith.constant 0 : i32
    %c0_i32_1 = arith.constant 0 : i32
    return %c0_i32, %c0_i32_0 : i32, i32
  }
  func.func @transform_2(%arg0: i32, %arg1: i32) -> (i32, i32) {
    %c0_i32 = arith.constant 0 : i32
    %c0_i32_0 = arith.constant 0 : i32
    %c0_i32_1 = arith.constant 0 : i32
    return %c0_i32, %c0_i32_0 : i32, i32
  }
  func.func @transform_3(%arg0: i32, %arg1: i32) -> (i32, i32) {
    %c0_i32 = arith.constant 0 : i32
    %c0_i32_0 = arith.constant 0 : i32
    %c0_i32_1 = arith.constant 0 : i32
    return %c0_i32, %c0_i32_0 : i32, i32
  }
  func.func @transform_4(%arg0: i32, %arg1: i32) -> (i32, i32) {
    %c0_i32 = arith.constant 0 : i32
    %c0_i32_0 = arith.constant 0 : i32
    %c0_i32_1 = arith.constant 0 : i32
    return %c0_i32, %c0_i32_0 : i32, i32
  }
  func.func @transform_5(%arg0: i32, %arg1: i32) -> (i32, i32) {
    %c0_i32 = arith.constant 0 : i32
    %c0_i32_0 = arith.constant 0 : i32
    return %c0_i32, %arg1 : i32, i32
  }
  func.func @transform_6(%arg0: i32, %arg1: i32) -> (i32, i32) {
    %c0_i32 = arith.constant 0 : i32
    %c0_i32_0 = arith.constant 0 : i32
    return %c0_i32, %arg1 : i32, i32
  }
  func.func @transform_7(%arg0: i32, %arg1: i32) -> (i32, i32) {
    %c0_i32 = arith.constant 0 : i32
    return %arg0, %arg1 : i32, i32
  }
}

</mosaic_0001>

<bundles_post_ra>
// kernel: sparse_head.1
= control target key start
LH: loop header
LB: loop body
LE: loop exit
PB: predicated region body
PF: predicated region fallthrough
CT: control target
= control target key end

     0   :  { %12 = vsyncpa [#allocation4], 0  ;;  %s934_s0 = inlined_call_operand.hbm [shape: bf16[16,128], index: 0, kind: input, shape index: {}]   ;;  %s935_s1 = inlined_call_operand.hbm [shape: bf16[128,128], index: 1, kind: input, shape index: {}]   ;;  %s936_s2 = inlined_call_operand.hbm [shape: f32[1,128], index: 2, kind: input, shape index: {}]   ;;  %s937_s3 = inlined_call_operand.hbm [shape: f32[1,128], index: 3, kind: input, shape index: {}]   ;;  %s938_s4 = inlined_call_operand.hbm [shape: f32[1,128], index: 4, kind: input, shape index: {}]   ;;  %s939_s5 = inlined_call_operand.hbm [shape: bf16[128,128], index: 5, kind: input, shape index: {}]   ;;  %s940_s6 = inlined_call_operand.hbm [shape: f32[1,128], index: 6, kind: input, shape index: {}]   ;;  %s941_s7 = inlined_call_operand.hbm [shape: f32[16,128], index: 7, kind: output, shape index: {}]  }
   0x1   :  { %13 = vsyncpa [#allocation7], 0 }
   0x2   :  { %14 = vsyncpa [#allocation10], 0 }
   0x3   :  { %15 = vsyncpa [#allocation13], 0 }
   0x4   :  { %16 = vsyncpa [#allocation5], 0  ;;  %s742_s24 = smov [#allocation6]   ;;  %s743_s26 = smov [#allocation9]  }
   0x5   :  { %s34_s25 = sshll.u32 %s742_s24, 4  ;;  %s57_s27 = sshll.u32 %s743_s26, 4  ;;  %s35_s25 = int_to_ptr.vmem [resolvable:$true] %s34_s25  ;;  %s796_s27 = int_to_ptr.vmem [resolvable:$true] %s57_s27 }
   0x6   :  { %s556_s30 = scalar_lea.hbm %s935_s1, 1024 }
   0x7   :  { %p557_p0 = scmp.ne.s32.totalorder %s935_s1, %s556_s30  ;;  %p560_p1 = scmp.lt.u32.totalorder %s556_s30, %s935_s1 }
   0x9   :  { %p562_p2 = pnand %p560_p1, %p557_p0 }
   0xb   :  { %565 = shalt.err (!%p562_p2)
}
   0xc   :  { %s566_s12 = scalar_lea.vmem %s35_s25, 1024  ;;  %p571_p4 = scmp.lt.s32.totalorder %s35_s25, %s35_s25 }
   0xd   :  { %p567_p3 = scmp.ne.s32.totalorder %s35_s25, %s566_s12  ;;  %p572_p5 = scmp.lt.s32.totalorder %s566_s12, %s566_s12 }
   0xf   :  { %p573_p6 = por %p572_p5, %p571_p4 }
  0x11   :  { %p574_p7 = pnand %p573_p6, %p567_p3 }
  0x13   :  { %577 = shalt.err (!%p574_p7)
}
  0x14   :  { %s744_s13 = smov 64   ;;  %s745_s14 = smov 4  }
  0x15   :  { %40 = dma.hbm_to_vmem [thread:$0]  %s935_s1, 1024, %s35_s25, [#allocation7], %s744_s13, %s744_s13, %s745_s14  }
  0x16   :  { %s578_s19 = scalar_lea.hbm %s937_s3, 16 }
  0x17   :  { %p579_p8 = scmp.ne.s32.totalorder %s937_s3, %s578_s19  ;;  %p582_p9 = scmp.lt.u32.totalorder %s578_s19, %s937_s3 }
  0x19   :  { %p584_p10 = pnand %p582_p9, %p579_p8 }
  0x1b   :  { %587 = shalt.err (!%p584_p10)
}
  0x1c   :  { %s588_s24 = scalar_lea.vmem %s796_s27, 16  ;;  %s592_s1 = scalar_lea.vmem %s796_s27, 32 }
  0x1d   :  { %p589_p11 = scmp.ne.s32.totalorder %s796_s27, %s588_s24  ;;  %p593_p12 = scmp.lt.s32.totalorder %s796_s27, %s796_s27 }
  0x1e   :  { %p594_p13 = scmp.lt.s32.totalorder %s592_s1, %s588_s24 }
  0x20   :  { %p595_p0 = por %p594_p13, %p593_p12 }
  0x22   :  { %p596_p1 = pnand %p595_p0, %p589_p11 }
  0x24   :  { %599 = shalt.err (!%p596_p1)
}
  0x25   :  { %60 = dma.hbm_to_vmem [thread:$0]  %s937_s3, 16, %s796_s27, [#allocation10]  }
  0x26   :  { %s746_s28 = smov [#allocation12]   ;;  %s747_s30 = smov [#allocation3]  }
  0x27   :  { %s76_s29 = sshll.u32 %s746_s28, 4  ;;  %s22_s8 = sshll.u32 %s747_s30, 4  ;;  %s77_s29 = int_to_ptr.vmem [resolvable:$true] %s76_s29  ;;  %s831_s8 = int_to_ptr.vmem [resolvable:$true] %s22_s8 }
  0x28   :  { %s600_s11 = scalar_lea.hbm %s939_s5, 1024 }
  0x29   :  { %p601_p2 = scmp.ne.s32.totalorder %s939_s5, %s600_s11  ;;  %p604_p3 = scmp.lt.u32.totalorder %s600_s11, %s939_s5 }
  0x2b   :  { %p606_p4 = pnand %p604_p3, %p601_p2 }
  0x2d   :  { %609 = shalt.err (!%p606_p4)
}
  0x2e   :  { %s610_s3 = scalar_lea.vmem %s77_s29, 1024  ;;  %p615_p6 = scmp.lt.s32.totalorder %s77_s29, %s77_s29 }
  0x2f   :  { %p611_p5 = scmp.ne.s32.totalorder %s77_s29, %s610_s3  ;;  %p616_p7 = scmp.lt.s32.totalorder %s610_s3, %s610_s3 }
  0x31   :  { %p617_p8 = por %p616_p7, %p615_p6 }
  0x33   :  { %p618_p9 = pnand %p617_p8, %p611_p5 }
  0x35   :  { %621 = shalt.err (!%p618_p9)
}
  0x36   :  { %82 = dma.hbm_to_vmem [thread:$0]  %s939_s5, 1024, %s77_s29, [#allocation13], %s744_s13, %s744_s13, %s745_s14  }
  0x37   :  { %s622_s21 = scalar_lea.hbm %s934_s0, 128 }
  0x38   :  { %p623_p10 = scmp.ne.s32.totalorder %s934_s0, %s622_s21  ;;  %p626_p11 = scmp.lt.u32.totalorder %s622_s21, %s934_s0 }
  0x3a   :  { %p628_p12 = pnand %p626_p11, %p623_p10 }
  0x3c   :  { %631 = shalt.err (!%p628_p12)
}
  0x3d   :  { %s632_s25 = scalar_lea.vmem %s831_s8, 128  ;;  %p637_p0 = scmp.lt.s32.totalorder %s831_s8, %s831_s8 }
  0x3e   :  { %p633_p13 = scmp.ne.s32.totalorder %s831_s8, %s632_s25  ;;  %p638_p1 = scmp.lt.s32.totalorder %s632_s25, %s632_s25 }
  0x40   :  { %p639_p2 = por %p638_p1, %p637_p0 }
  0x42   :  { %p640_p3 = pnand %p639_p2, %p633_p13 }
  0x44   :  { %643 = shalt.err (!%p640_p3)
}
  0x45   :  { %28 = dma.hbm_to_vmem [thread:$0]  %s934_s0, 128, %s831_s8, [#allocation4], %s744_s13, %s744_s13, %s745_s14  }
  0x46   :  { %s748_s28 = smov [#allocation8]   ;;  %s749_s30 = smov [#allocation11]  }
  0x47   :  { %s47_s29 = sshll.u32 %s748_s28, 4  ;;  %s67_s9 = sshll.u32 %s749_s30, 4  ;;  %s48_s29 = int_to_ptr.vmem [resolvable:$true] %s47_s29  ;;  %s68_s9 = int_to_ptr.vmem [resolvable:$true] %s67_s9 }
  0x48   :  { %s644_s12 = scalar_lea.hbm %s936_s2, 16 }
  0x49   :  { %p645_p4 = scmp.ne.s32.totalorder %s936_s2, %s644_s12  ;;  %p648_p5 = scmp.lt.u32.totalorder %s644_s12, %s936_s2 }
  0x4b   :  { %p650_p6 = pnand %p648_p5, %p645_p4 }
  0x4d   :  { %653 = shalt.err (!%p650_p6)
}
  0x4e   :  { %s654_s0 = scalar_lea.vmem %s48_s29, 16  ;;  %s658_s13 = scalar_lea.vmem %s48_s29, 32 }
  0x4f   :  { %p655_p7 = scmp.ne.s32.totalorder %s48_s29, %s654_s0  ;;  %p659_p8 = scmp.lt.s32.totalorder %s48_s29, %s48_s29 }
  0x50   :  { %p660_p9 = scmp.lt.s32.totalorder %s658_s13, %s654_s0 }
  0x52   :  { %p661_p10 = por %p660_p9, %p659_p8 }
  0x54   :  { %p662_p11 = pnand %p661_p10, %p655_p7 }
  0x56   :  { %665 = shalt.err (!%p662_p11)
}
  0x57   :  { %50 = dma.hbm_to_vmem [thread:$0]  %s936_s2, 16, %s48_s29, [#allocation7]  }
  0x58   :  { %s666_s19 = scalar_lea.hbm %s938_s4, 16 }
  0x59   :  { %p667_p12 = scmp.ne.s32.totalorder %s938_s4, %s666_s19  ;;  %p670_p13 = scmp.lt.u32.totalorder %s666_s19, %s938_s4 }
  0x5b   :  { %p672_p0 = pnand %p670_p13, %p667_p12 }
  0x5d   :  { %675 = shalt.err (!%p672_p0)
}
  0x5e   :  { %s676_s24 = scalar_lea.vmem %s68_s9, 16  ;;  %s680_s1 = scalar_lea.vmem %s68_s9, 32 }
  0x5f   :  { %p677_p1 = scmp.ne.s32.totalorder %s68_s9, %s676_s24  ;;  %p681_p2 = scmp.lt.s32.totalorder %s68_s9, %s68_s9 }
  0x60   :  { %p682_p3 = scmp.lt.s32.totalorder %s680_s1, %s676_s24 }
  0x62   :  { %p683_p4 = por %p682_p3, %p681_p2 }
  0x64   :  { %p684_p5 = pnand %p683_p4, %p677_p1 }
  0x66   :  { %687 = shalt.err (!%p684_p5)
}
  0x67   :  { %70 = dma.hbm_to_vmem [thread:$0]  %s938_s4, 16, %s68_s9, [#allocation10]  }
  0x68   :  { %s750_s5 = smov [#allocation14]   ;;  %s688_s30 = scalar_lea.hbm %s940_s6, 16 }
  0x69   :  { %s89_s26 = sshll.u32 %s750_s5, 4  ;;  %p689_p6 = scmp.ne.s32.totalorder %s940_s6, %s688_s30  ;;  %s90_s26 = int_to_ptr.vmem [resolvable:$true] %s89_s26 }
  0x6a   :  { %p692_p7 = scmp.lt.u32.totalorder %s688_s30, %s940_s6 }
  0x6c   :  { %p694_p8 = pnand %p692_p7, %p689_p6 }
  0x6e   :  { %697 = shalt.err (!%p694_p8)
}
  0x6f   :  { %s698_s16 = scalar_lea.vmem %s90_s26, 16  ;;  %s702_s4 = scalar_lea.vmem %s90_s26, 32 }
  0x70   :  { %p699_p9 = scmp.ne.s32.totalorder %s90_s26, %s698_s16  ;;  %p703_p10 = scmp.lt.s32.totalorder %s90_s26, %s90_s26 }
  0x71   :  { %p704_p11 = scmp.lt.s32.totalorder %s702_s4, %s698_s16 }
  0x73   :  { %p705_p12 = por %p704_p11, %p703_p10 }
  0x75   :  { %p706_p13 = pnand %p705_p12, %p699_p9 }
  0x77   :  { %709 = shalt.err (!%p706_p13)
}
  0x78   :  { %92 = dma.hbm_to_vmem [thread:$0]  %s940_s6, 16, %s90_s26, [#allocation13]  }
  0x79   :  { %732 = dma.done.wait [#allocation4], 128  }
  0x7a   :  { %733 = vsyncadd [#allocation4], 4294967168 }
  0x7b   :  { %734 = dma.done.wait [#allocation7], 1040  }
  0x7c   :  { %735 = vsyncadd [#allocation7], 4294966256 }
  0x7d   :  { %736 = dma.done.wait [#allocation10], 32  }
  0x7e   :  { %737 = vsyncadd [#allocation10], 4294967264 }
  0x7f   :  { %738 = dma.done.wait [#allocation13], 1040  }
  0x80   :  { %739 = vsyncadd [#allocation13], 4294966256  ;;  %v751_v0 = vmov 0.0   ;;  %vm752_vm0 = vmmov 0   ;;  %v531_v1 = vld [vmem:[#allocation6] sm:$0xff]   ;;  %v532_v2 = vld [vmem:[#allocation6 + $0x8] sm:$0xff]  }
  0x81   :  { %477 = vmatprep.subr.bf16.mxu0 %v751_v0  ;;  %493 = vmatprep.mubr.msk.bf16.mxu0 %vm752_vm0, %v751_v0  ;;  %v533_v3 = vld [vmem:[#allocation6 + $0x10] sm:$0xff]   ;;  %v534_v4 = vld [vmem:[#allocation6 + $0x18] sm:$0xff]   ;;  %v535_v5 = vld [vmem:[#allocation6 + $0x20] sm:$0xff]   ;;  %s753_s6 = smov [#allocation15]  }
  0x82   :  { %497 = vmatprep.subr.bf16.mxu1 %v751_v0  ;;  %513 = vmatprep.mubr.msk.bf16.mxu1 %vm752_vm0, %v751_v0  ;;  %v536_v6 = vld [vmem:[#allocation6 + $0x28] sm:$0xff]   ;;  %v537_v7 = vld [vmem:[#allocation6 + $0x30] sm:$0xff]   ;;  %v538_v8 = vld [vmem:[#allocation6 + $0x38] sm:$0xff]   ;;  %s423_s3 = sshll.u32 %s753_s6, 4  ;;  %s424_s3 = int_to_ptr.vmem [resolvable:$true] %s423_s3 }
  0x83   :  { %478 = vmatpush3.bf16.msra.mxu0 %v531_v1  ;;  %v539_v9 = vld [vmem:[#allocation3] sm:$0xff]   ;;  %v438_v10 = vld [vmem:[#allocation8] ss:$0 sm:$0xff]  ;;  %v540_v37 = vld [vmem:[#allocation12] sm:$0xff]   ;;  %s710_s0 = scalar_lea.vmem %s424_s3, 256  ;;  %p715_p1 = scmp.lt.s32.totalorder %s424_s3, %s424_s3 }
  0x84   :  { %479 = vmatprep.subr.bf16.mxu0 %v751_v0  ;;  %498 = vmatpush3.bf16.msra.mxu1 %v540_v37  ;;  %v541_v38 = vld [vmem:[#allocation12 + $0x8] sm:$0xff]   ;;  %v542_v39 = vld [vmem:[#allocation12 + $0x10] sm:$0xff]   ;;  %v543_v40 = vld [vmem:[#allocation12 + $0x18] sm:$0xff]   ;;  %p711_p0 = scmp.ne.s32.totalorder %s424_s3, %s710_s0  ;;  %p716_p2 = scmp.lt.s32.totalorder %s710_s0, %s710_s0 }
  0x85   :  { %499 = vmatprep.subr.bf16.mxu1 %v751_v0  ;;  %v544_v41 = vld [vmem:[#allocation12 + $0x20] sm:$0xff]   ;;  %v545_v42 = vld [vmem:[#allocation12 + $0x28] sm:$0xff]   ;;  %v546_v43 = vld [vmem:[#allocation12 + $0x30] sm:$0xff]  }
  0x86   :  { %v547_v44 = vld [vmem:[#allocation12 + $0x38] sm:$0xff]   ;;  %p717_p3 = por %p716_p2, %p715_p1 }
  0x87   :  { %480 = vmatpush3.bf16.msra.mxu0 %v532_v2  ;;  %v448_v62 = vld [vmem:[#allocation9] ss:$0 sm:$0xff] }
  0x88   :  { %481 = vmatprep.subr.bf16.mxu0 %v751_v0  ;;  %500 = vmatpush3.bf16.msra.mxu1 %v541_v38  ;;  %p718_p4 = pnand %p717_p3, %p711_p0 }
  0x89   :  { %501 = vmatprep.subr.bf16.mxu1 %v751_v0 }
  0x8b   :  { %482 = vmatpush3.bf16.msra.mxu0 %v533_v3  ;;  %v449_v3 = vld [vmem:[#allocation11] ss:$0 sm:$0xff] }
  0x8c   :  { %483 = vmatprep.subr.bf16.mxu0 %v751_v0  ;;  %502 = vmatpush3.bf16.msra.mxu1 %v542_v39 }
  0x8d   :  { %503 = vmatprep.subr.bf16.mxu1 %v751_v0 }
  0x8f   :  { %484 = vmatpush3.bf16.msra.mxu0 %v534_v4 }
  0x90   :  { %485 = vmatprep.subr.bf16.mxu0 %v751_v0  ;;  %504 = vmatpush3.bf16.msra.mxu1 %v543_v40 }
  0x91   :  { %505 = vmatprep.subr.bf16.mxu1 %v751_v0 }
  0x93   :  { %486 = vmatpush3.bf16.msra.mxu0 %v535_v5 }
  0x94   :  { %487 = vmatprep.subr.bf16.mxu0 %v751_v0  ;;  %506 = vmatpush3.bf16.msra.mxu1 %v544_v41 }
  0x95   :  { %507 = vmatprep.subr.bf16.mxu1 %v751_v0 }
  0x97   :  { %488 = vmatpush3.bf16.msra.mxu0 %v536_v6 }
  0x98   :  { %489 = vmatprep.subr.bf16.mxu0 %v751_v0  ;;  %508 = vmatpush3.bf16.msra.mxu1 %v545_v42 }
  0x99   :  { %509 = vmatprep.subr.bf16.mxu1 %v751_v0 }
  0x9b   :  { %490 = vmatpush3.bf16.msra.mxu0 %v537_v7 }
  0x9c   :  { %491 = vmatprep.subr.bf16.mxu0 %v751_v0  ;;  %510 = vmatpush3.bf16.msra.mxu1 %v546_v43 }
  0x9d   :  { %511 = vmatprep.subr.bf16.mxu1 %v751_v0 }
  0x9f   :  { %492 = vmatpush3.bf16.msra.mxu0 %v538_v8  ;;  %v450_v8 = vld [vmem:[#allocation14] ss:$0 sm:$0xff] }
  0xa0   :  { %512 = vmatpush3.bf16.msra.mxu1 %v547_v44 }
  0xa2   :  { %494 = vmatmul.mubr.bf16.vlgmr.msra.gmra.mrb[0].mxu0 %v539_v9 }
 0x175   :  { %v232_v11 = vpop.f32.mrb[0].mxu0 }
 0x176   :  { %v233_v12 = vadd.f32 %v438_v10, %v232_v11  ;;  %v495_v13 = vpop.f32.mrb[1].mxu0 }
 0x177   :  { %v235_v14 = vpop.f32.mrb[2].mxu0 }
 0x178   :  { %v241_v15 = vmul.f32 0.044715, %v233_v12  ;;  %v236_v16 = vadd.f32 %v438_v10, %v235_v14  ;;  %v496_v17 = vpop.f32.mrb[3].mxu0  ;;  %v239_v28 = vmul.f32 0.5, %v233_v12 }
 0x17a   :  { %v243_v18 = vmul.f32 %v241_v15, %v233_v12  ;;  %v242_v19 = vmul.f32 0.044715, %v236_v16  ;;  %v240_v32 = vmul.f32 0.5, %v236_v16 }
 0x17c   :  { %v244_v20 = vmul.f32 %v242_v19, %v236_v16  ;;  %v245_v21 = vmul.f32 %v243_v18, %v233_v12 }
 0x17e   :  { %v247_v22 = vadd.f32 %v245_v21, %v233_v12  ;;  %v246_v23 = vmul.f32 %v244_v20, %v236_v16 }
 0x180   :  { %v249_v24 = vmul.f32 0.7978846, %v247_v22  ;;  %v248_v25 = vadd.f32 %v246_v23, %v236_v16 }
 0x182   :  { %548 = vtanh.f32 %v249_v24  ;;  %v250_v26 = vmul.f32 0.7978846, %v248_v25 }
 0x184   :  { %550 = vtanh.f32 %v250_v26 }
 0x18c   :  { %v549_v27 = vpop.eup %548 }
 0x18d   :  { %v253_v29 = vadd.f32 1.0, %v549_v27 }
 0x18e   :  { %v551_v30 = vpop.eup %550 }
 0x18f   :  { %v255_v31 = vmul.f32 %v253_v29, %v239_v28  ;;  %v254_v33 = vadd.f32 1.0, %v551_v30 }
 0x191   :  { %257 = vadd.xlane.f32.xlu0 %v255_v31  ;;  %v263_v34 = vmul.f32 %v255_v31, %v255_v31  ;;  %v256_v35 = vmul.f32 %v254_v33, %v240_v32 }
 0x193   :  { %265 = vadd.xlane.f32.xlu1 %v263_v34  ;;  %v264_v36 = vmul.f32 %v256_v35, %v256_v35 }
 0x195   :  { %259 = vadd.xlane.f32.xlu0 %v256_v35 }
 0x197   :  { %267 = vadd.xlane.f32.xlu1 %v264_v36 }
 0x21e   :  { %v258_v45 = vpop.xlane.xlu0 %257 }
 0x21f   :  { %v261_v46 = vmul.f32 0.03125, %v258_v45 }
 0x220   :  { %v266_v47 = vpop.xlane.xlu1 %265 }
 0x221   :  { %v271_v48 = vmul.f32 %v261_v46, %v261_v46  ;;  %v269_v49 = vmul.f32 0.03125, %v266_v47  ;;  %v275_v59 = vsub.f32 %v255_v31, %v261_v46 }
 0x222   :  { %v260_v50 = vpop.xlane.xlu0 %259 }
 0x223   :  { %v273_v51 = vsub.f32 %v269_v49, %v271_v48  ;;  %v262_v52 = vmul.f32 0.03125, %v260_v50 }
 0x224   :  { %v268_v53 = vpop.xlane.xlu1 %267 }
 0x225   :  { %v277_v54 = vadd.f32 1e-12, %v273_v51  ;;  %v272_v55 = vmul.f32 %v262_v52, %v262_v52  ;;  %v270_v56 = vmul.f32 0.03125, %v268_v53  ;;  %v276_v63 = vsub.f32 %v256_v35, %v262_v52 }
 0x227   :  { %552 = vrsqrt.f32 %v277_v54  ;;  %v274_v57 = vsub.f32 %v270_v56, %v272_v55 }
 0x229   :  { %v278_v58 = vadd.f32 1e-12, %v274_v57 }
 0x22b   :  { %554 = vrsqrt.f32 %v278_v58 }
 0x231   :  { %v553_v60 = vpop.eup %552 }
 0x232   :  { %v281_v61 = vmul.f32 %v553_v60, %v275_v59 }
 0x234   :  { %v290_v2 = vmul.f32 %v448_v62, %v281_v61 }
 0x235   :  { %v555_v0 = vpop.eup %554 }
 0x236   :  { %v282_v1 = vmul.f32 %v555_v0, %v276_v63  ;;  %v299_v5 = vadd.f32 %v449_v3, %v290_v2 }
 0x238   :  { %v291_v4 = vmul.f32 %v448_v62, %v282_v1 }
 0x23a   :  { %v300_v6 = vadd.f32 %v449_v3, %v291_v4 }
 0x23c   :  { %v301_v7 = vpack.c.bf16 %v300_v6, %v299_v5 }
 0x23e   :  { %514 = vmatmul.mubr.bf16.vlgmr.msra.gmra.mrb[0].mxu1 %v301_v7 }
 0x311   :  { %v409_v9 = vpop.f32.mrb[0].mxu1 }
 0x312   :  { %v410_v10 = vadd.f32 %v450_v8, %v409_v9  ;;  %v515_v11 = vpop.f32.mrb[1].mxu1 }
 0x313   :  { %v412_v12 = vpop.f32.mrb[2].mxu1 }
 0x314   :  { %416 = vst [vmem:[#allocation15] sm:$0xff] %v410_v10  ;;  %v413_v13 = vadd.f32 %v450_v8, %v412_v12  ;;  %v516_v14 = vpop.f32.mrb[3].mxu1 }
 0x316   :  { %417 = vst [vmem:[#allocation15 + $0x8] sm:$0xff] %v413_v13 }
 0x317   :  { %721 = shalt.err (!%p718_p4)
}
 0x318   :  { %s722_s8 = scalar_lea.hbm %s941_s7, 256 }
 0x319   :  { %p723_p5 = scmp.ne.s32.totalorder %s941_s7, %s722_s8  ;;  %p726_p6 = scmp.lt.u32.totalorder %s722_s8, %s941_s7 }
 0x31b   :  { %p728_p7 = pnand %p726_p6, %p723_p5 }
 0x31d   :  { %731 = shalt.err (!%p728_p7)
}
 0x31e   :  { %s754_s21 = smov 128   ;;  %s755_s22 = smov 8  }
 0x31f   :  { %429 = dma.vmem_to_hbm [thread:$0]  %s424_s3, 256, %s941_s7, [#allocation5], %s754_s21, %s754_s21, %s755_s22  }
 0x320   :  { %740 = dma.done.wait [#allocation5], 256  }
 0x321   :  { %741 = vsyncadd [#allocation5], 4294967040 }
 0x322   :  { %433 = vsyncpa [#allocation4], 1 }
 0x323   :  { %434 = vsyncpa [#allocation7], 1 }
 0x324   :  { %435 = vsyncpa [#allocation10], 1 }
 0x325   :  { %436 = vsyncpa [#allocation13], 1 }
 0x326   :  { %437 = vsyncpa [#allocation5], 1 }

</bundles_post_ra>
